<compile_context>
chip_gen: v5e
topology: v5e:2x2
jax: 0.10.0
libtpu: 0.0.40
codegen_flags: <defaults>
</compile_context>

<pallas_src>
import re

import jax
import jax.numpy as jnp
from jax.experimental import pallas as pl
from jax.experimental.pallas import tpu as pltpu


def _tpu_generation():
    """Best-effort TPU generation number (5, 6, 7, ...) or None."""
    try:
        kind = jax.devices()[0].device_kind
    except Exception:
        return None
    m = re.search(r"v(\d+)", str(kind).lower())
    return int(m.group(1)) if m else None


def _make_senet_kernel(hw_true, ew_dtype):
    """hw_true = spatial size H*W; ew_dtype = elementwise compute dtype."""
    inv_hw = 1.0 / float(hw_true)

    def kernel(x_ref, w1_ref, w2_ref, o_ref):
        # x_ref: (Nb, C, HW)   w1_ref: (Cmid, C)   w2_ref: (C, Cmid)

        # ---- squeeze: global average pool (f32 accumulation). The cast feeds
        # only this reduction (no shared f32 copy of the whole tile). ----
        s = jnp.sum(x_ref[...].astype(jnp.float32), axis=-1)            # (Nb, C)
        avg = s * inv_hw

        # ---- excitation: two 1x1 convs == channel matmuls (MXU, f32) ----
        w1 = w1_ref[...].astype(jnp.float32)
        w2 = w2_ref[...].astype(jnp.float32)
        z1 = jax.lax.dot_general(avg, w1, (((1,), (1,)), ((), ())),
                                 preferred_element_type=jnp.float32)    # (Nb, Cmid)
        z1 = jnp.maximum(z1, 0.0)                                        # ReLU
        z2 = jax.lax.dot_general(z1, w2, (((1,), (1,)), ((), ())),
                                 preferred_element_type=jnp.float32)    # (Nb, C)

        # ---- scale then sigmoid.  NOTE: sigmoid is applied AFTER the multiply
        # x * excitation, per the reference module's (non-standard) forward. ----
        z2e = z2.astype(ew_dtype)
        t = x_ref[...].astype(ew_dtype) * z2e[:, :, None]                # (Nb, C, HW)
        half = jnp.asarray(0.5, ew_dtype)
        one = jnp.asarray(1.0, ew_dtype)
        # single-EUP sigmoid: sigmoid(t) = 0.5 * (tanh(0.5*t) + 1)
        out = half * (jnp.tanh(half * t) + one)
        o_ref[...] = out.astype(o_ref.dtype)

    return kernel


def senet_forward(x, w1, w2):
    """x: (N, C, H, W); w1: (C//16, C); w2: (C, C//16). Returns (N, C, H, W)."""
    N, C, H, W = x.shape
    HW = H * W
    x_flat = x.reshape(N, C, HW)

    gen = _tpu_generation()

    # Elementwise compute dtype: bf16 on bf16-VPU/EUP generations (v6e/v7x)
    # when the I/O is bf16; f32 otherwise (v5e has no bf16 VPU/EUP).
    if x.dtype == jnp.bfloat16 and gen is not None and gen >= 6:
        ew_dtype = jnp.bfloat16
    else:
        ew_dtype = jnp.float32

    itemsize = jnp.dtype(x.dtype).itemsize
    ew_itemsize = jnp.dtype(ew_dtype).itemsize
    # Per-batch-row VMEM: double-buffered in + out blocks plus ~2 elementwise temps.
    per_batch_bytes = C * HW * (4 * itemsize + 2 * ew_itemsize)

    # Generation-aware VMEM budget: v7x has 64 MiB per TC; v5e/v6e have 128 MiB.
    if gen is not None and gen >= 7:
        tile_budget = 24 * 1024 * 1024
        vmem_cap = 48 * 1024 * 1024
    else:
        tile_budget = 56 * 1024 * 1024
        vmem_cap = 100 * 1024 * 1024

    nb_cap = max(1, tile_budget // per_batch_bytes)
    nb_cap = min(nb_cap, N)
    if N >= 2:
        nb_cap = min(nb_cap, N // 2)       # keep >= 2 grid steps for megacore
    nb_cap = max(1, nb_cap)

    # Largest divisor of N not exceeding the cap; prefer an EVEN grid length
    # so v7x's two TensorCores split the "parallel" axis evenly.
    divisors = [d for d in range(1, nb_cap + 1) if N % d == 0]
    even_grid = [d for d in divisors if (N // d) % 2 == 0]
    Nb = max(even_grid) if even_grid else max(divisors)

    weight_bytes = 2 * (w1.size * jnp.dtype(w1.dtype).itemsize
                        + w2.size * jnp.dtype(w2.dtype).itemsize)
    vmem_need = Nb * per_batch_bytes + weight_bytes
    vmem_limit = int(min(max(2 * vmem_need, 32 * 1024 * 1024), vmem_cap))

    kernel = _make_senet_kernel(HW, ew_dtype)

    out_flat = pl.pallas_call(
        kernel,
        out_shape=jax.ShapeDtypeStruct((N, C, HW), x.dtype),
        grid_spec=pltpu.PrefetchScalarGridSpec(
            num_scalar_prefetch=0,
            grid=(N // Nb,),
            in_specs=[
                # Last two block dims equal the full array dims -> no pad needed.
                pl.BlockSpec((Nb, C, HW), lambda b: (b, 0, 0)),
                pl.BlockSpec(w1.shape, lambda b: (0, 0)),
                pl.BlockSpec(w2.shape, lambda b: (0, 0)),
            ],
            out_specs=pl.BlockSpec((Nb, C, HW), lambda b: (b, 0, 0)),
        ),
        compiler_params=pltpu.CompilerParams(
            dimension_semantics=("parallel",),
            vmem_limit_bytes=vmem_limit),
    )(x_flat, w1, w2)

    return out_flat.reshape(N, C, H, W)


def senet_reference(x, w1, w2):
    """Pure-JAX reference mirroring the PyTorch forward."""
    avg = jnp.mean(x, axis=(2, 3), keepdims=True)               # (N, C, 1, 1)
    z1 = jnp.einsum('oc,nchw->nohw', w1, avg)                   # (N, Cmid, 1, 1)
    z1 = jnp.maximum(z1, 0.0)
    z2 = jnp.einsum('co,nohw->nchw', w2, z1)                    # (N, C, 1, 1)
    return jax.nn.sigmoid(x * z2)


if __name__ == "__main__":
    # in_planes must be >= 16 so in_planes // 16 >= 1
    N, C = 2, 32
    Cmid = C // 16

    key = jax.random.PRNGKey(0)
    kx, k1, k2, kx2 = jax.random.split(key, 4)

    # 1x1 conv weights (bias=False): (out_ch, in_ch, 1, 1) squeezed to 2D
    w1 = 0.1 * jax.random.normal(k1, (Cmid, C), dtype=jnp.float32)
    w2 = 0.1 * jax.random.normal(k2, (C, Cmid), dtype=jnp.float32)

    # --- f32 path, HW a multiple of 128 (16x16) ---
    H = W = 16
    x = jax.random.normal(kx, (N, C, H, W), dtype=jnp.float32)
    out = jax.block_until_ready(senet_forward(x, w1, w2))
    ref = senet_reference(x, w1, w2)
    assert out.shape == (N, C, H, W)
    assert jnp.allclose(out, ref, atol=1e-5, rtol=1e-5)

    # --- f32 path, HW NOT a multiple of 128 (7x7 -> 49): no pad / no slice ---
    H2 = W2 = 7
    x2 = jax.random.normal(kx2, (N, C, H2, W2), dtype=jnp.float32)
    out2 = jax.block_until_ready(senet_forward(x2, w1, w2))
    ref2 = senet_reference(x2, w1, w2)
    assert jnp.allclose(out2, ref2, atol=1e-5, rtol=1e-5)

    # --- bf16 I/O path (bf16 elementwise on v6e/v7x, f32 compute on v5e) ---
    x_bf = x.astype(jnp.bfloat16)
    out_bf = jax.block_until_ready(senet_forward(x_bf, w1, w2))
    ref_bf = senet_reference(x_bf.astype(jnp.float32), w1, w2)
    assert out_bf.dtype == jnp.bfloat16
    assert jnp.allclose(out_bf.astype(jnp.float32), ref_bf, atol=2e-2, rtol=2e-2)

    print("KERNEL_OK")
</pallas_src>

<mosaic_0001>
module attributes {stable_mosaic.version = 11 : i64} {
  func.func @kernel(%arg0: i32, %arg1: memref<1x32x256xf32, #tpu.memory_space<vmem>>, %arg2: memref<2x32xf32, #tpu.memory_space<vmem>>, %arg3: memref<32x2xf32, #tpu.memory_space<vmem>>, %arg4: memref<1x32x256xf32, #tpu.memory_space<vmem>>) attributes {dimension_semantics = [#tpu.dimension_semantics<parallel>], iteration_bounds = array<i64: 2>, scalar_prefetch = 0 : i64, scratch_operands = 0 : i64, tpu.core_type = #tpu.core_type<tc>, window_params = [{transform_indices = @transform_0, window_bounds = array<i64: 1, 32, 256>}, {pipeline_mode = #tpu.pipeline_mode<synchronous>, transform_indices = @transform_1, window_bounds = array<i64: 2, 32>}, {pipeline_mode = #tpu.pipeline_mode<synchronous>, transform_indices = @transform_2, window_bounds = array<i64: 32, 2>}, {transform_indices = @transform_3, window_bounds = array<i64: 1, 32, 256>}]} {
    %c0 = arith.constant 0 : index
    %c0_0 = arith.constant 0 : index
    %c0_1 = arith.constant 0 : index
    %0 = vector.load %arg1[%c0, %c0_0, %c0_1] : memref<1x32x256xf32, #tpu.memory_space<vmem>>, vector<1x32x256xf32>
    %cst = arith.constant dense<0.000000e+00> : vector<1x32xf32>
    %1 = vector.multi_reduction <add>, %0, %cst [2] : vector<1x32x256xf32> to vector<1x32xf32>
    %cst_2 = arith.constant 3.906250e-03 : f32
    %2 = vector.broadcast %cst_2 : f32 to vector<1x32xf32>
    %3 = arith.mulf %1, %2 : vector<1x32xf32>
    %c0_3 = arith.constant 0 : index
    %c0_4 = arith.constant 0 : index
    %4 = vector.load %arg2[%c0_3, %c0_4] : memref<2x32xf32, #tpu.memory_space<vmem>>, vector<2x32xf32>
    %c0_5 = arith.constant 0 : index
    %c0_6 = arith.constant 0 : index
    %5 = vector.load %arg3[%c0_5, %c0_6] : memref<32x2xf32, #tpu.memory_space<vmem>>, vector<32x2xf32>
    %cst_7 = arith.constant dense<0.000000e+00> : vector<1x2xf32>
    %6 = tpu.matmul %3, %4, %cst_7 {dimension_numbers = #tpu.dot_dimension_numbers<[1], [1], [0], [0], [0, 0, 1, 0], [], []>} : vector<1x32xf32>, vector<2x32xf32>, vector<1x2xf32> -> vector<1x2xf32>
    %cst_8 = arith.constant 0.000000e+00 : f32
    %7 = vector.broadcast %cst_8 : f32 to vector<1x2xf32>
    %8 = arith.maximumf %6, %7 : vector<1x2xf32>
    %cst_9 = arith.constant dense<0.000000e+00> : vector<1x32xf32>
    %9 = tpu.matmul %8, %5, %cst_9 {dimension_numbers = #tpu.dot_dimension_numbers<[1], [1], [0], [0], [0, 0, 1, 0], [], []>} : vector<1x2xf32>, vector<32x2xf32>, vector<1x32xf32> -> vector<1x32xf32>
    %c0_10 = arith.constant 0 : index
    %c0_11 = arith.constant 0 : index
    %c0_12 = arith.constant 0 : index
    %10 = vector.load %arg1[%c0_10, %c0_11, %c0_12] : memref<1x32x256xf32, #tpu.memory_space<vmem>>, vector<1x32x256xf32>
    %11 = vector.shape_cast %9 : vector<1x32xf32> to vector<1x32x1xf32>
    %12 = vector.broadcast %11 : vector<1x32x1xf32> to vector<1x32x256xf32>
    %13 = arith.mulf %10, %12 : vector<1x32x256xf32>
    %cst_13 = arith.constant 5.000000e-01 : f32
    %14 = vector.broadcast %cst_13 : f32 to vector<1x32x256xf32>
    %15 = arith.mulf %14, %13 : vector<1x32x256xf32>
    %16 = math.tanh %15 : vector<1x32x256xf32>
    %cst_14 = arith.constant 1.000000e+00 : f32
    %17 = vector.broadcast %cst_14 : f32 to vector<1x32x256xf32>
    %18 = arith.addf %16, %17 : vector<1x32x256xf32>
    %cst_15 = arith.constant 5.000000e-01 : f32
    %19 = vector.broadcast %cst_15 : f32 to vector<1x32x256xf32>
    %20 = arith.mulf %19, %18 : vector<1x32x256xf32>
    %c0_16 = arith.constant 0 : index
    %c0_17 = arith.constant 0 : index
    %c0_18 = arith.constant 0 : index
    %21 = vector.load %arg4[%c0_16, %c0_17, %c0_18] : memref<1x32x256xf32, #tpu.memory_space<vmem>>, vector<1x32x256xf32>
    tpu.vector_store %arg4[%c0_16, %c0_17, %c0_18], %20 {strides = array<i32>} : memref<1x32x256xf32, #tpu.memory_space<vmem>>, vector<1x32x256xf32>,
    return
  }
  func.func @transform_0(%arg0: i32) -> (i32, i32, i32) {
    %c0_i32 = arith.constant 0 : i32
    %c0_i32_0 = arith.constant 0 : i32
    %c0_i32_1 = arith.constant 0 : i32
    return %arg0, %c0_i32, %c0_i32_0 : i32, i32, i32
  }
  func.func @transform_1(%arg0: i32) -> (i32, i32) {
    %c0_i32 = arith.constant 0 : i32
    %c0_i32_0 = arith.constant 0 : i32
    %c0_i32_1 = arith.constant 0 : i32
    return %c0_i32, %c0_i32_0 : i32, i32
  }
  func.func @transform_2(%arg0: i32) -> (i32, i32) {
    %c0_i32 = arith.constant 0 : i32
    %c0_i32_0 = arith.constant 0 : i32
    %c0_i32_1 = arith.constant 0 : i32
    return %c0_i32, %c0_i32_0 : i32, i32
  }
  func.func @transform_3(%arg0: i32) -> (i32, i32, i32) {
    %c0_i32 = arith.constant 0 : i32
    %c0_i32_0 = arith.constant 0 : i32
    %c0_i32_1 = arith.constant 0 : i32
    return %arg0, %c0_i32, %c0_i32_0 : i32, i32, i32
  }
}

</mosaic_0001>

<bundles_post_ra>
// kernel: tpu_custom_call.1
= control target key start
LH: loop header
LB: loop body
LE: loop exit
PB: predicated region body
PF: predicated region fallthrough
CT: control target
= control target key end

     0   :  { %8 = vsyncpa [#allocation3], 0  ;;  %s876_s0 = inlined_call_operand.hbm [shape: f32[2,32,256], index: 0, kind: input, shape index: {}]   ;;  %s877_s1 = inlined_call_operand.vmem [shape: f32[2,32], index: 1, kind: input, shape index: {}]   ;;  %s878_s2 = inlined_call_operand.vmem [shape: f32[32,2], index: 2, kind: input, shape index: {}]   ;;  %s879_s3 = inlined_call_operand.hbm [shape: f32[2,32,256], index: 3, kind: output, shape index: {}]  }
   0x1   :  { %10 = vsyncpa [#allocation3 + $0x1], 0 }
   0x2   :  { %11 = vsyncpa [#allocation4], 0 }
   0x3   :  { %13 = vsyncpa [#allocation4 + $0x1], 0  ;;  %s680_s12 = smov 0   ;;  %s682_s13 = smov 0  }
   0x4   :  { %s684_s14 = smov 0   ;;  %s686_s15 = smov 0  }
   0x5 LB: > { %s701_s16 = sadd.s32 4294967295, %s654_s15   ;;  %s464_s17 = sadd.s32 4294967294, %s654_s15   ;;  %s654_s15 = sphi %s686_s15, %s889_s15   ;;  %s650_s14 = sphi %s684_s14, %s888_s14   ;;  %s646_s13 = sphi %s682_s13, %s887_s13   ;;  %s642_s12 = sphi %s680_s12, %s886_s12  }
   0x6   : > { %s705_s18 = sadd.s32 1, %s654_s15   ;;  %s26_s19 = sadd.s32 1, %s650_s14 }
   0x7   : > { %s23_s20 = ssub.s32 %s654_s15, %s705_s18  ;;  %p33_p0 = scmp.ne.s32.totalorder %s650_s14, %s646_s13 }
   0x8   : > { %p24_p1 = scmp.eq.s32.totalorder %s23_s20, 0  ;;  %p34_p2 = scmp.eq.s32.totalorder %s654_s15, 0 }
   0x9   : > { %p39_p3 = scmp.ne.s32.totalorder %s646_s13, %s642_s12  ;;  %p40_p4 = scmp.eq.s32.totalorder %s701_s16, 0 }
   0xa   : > { %s717_s21 = scalar_select %p24_p1, %s650_s14, %s26_s19  }
   0xb   : > { %p719_p5 = por %p34_p2, %p33_p0  ;;  %p723_p6 = por %p40_p4, %p39_p3 }
   0xc   : > { %p105_p7 = scmp.eq.s32.totalorder %s701_s16, 1  ;;  %p111_p8 = scmp.eq.s32.totalorder %s464_s17, 1 }
   0xd   : > { %p499_p10 = scmp.lt.s32.totalorder %s654_s15, 2  ;;  %s137_s26 = sand.u32 1, %s650_s14  }
   0xe   : > { %p730_p11 = por %p105_p7, %p33_p0  ;;  %p734_p12 = por %p111_p8, %p39_p3 }
   0xf   : > { %s485_s27 = sshll.u32 %s654_s15, 6  ;;  %s467_s28 = sshll.u32 %s137_s26, 6 }
  0x10   : > { %s146_s4 = scalar_lea.hbm %s876_s0, %s485_s27  ;;  %s141_s6 = scalar_lea.vmem [#allocation2], %s467_s28 }
  0x11   : > { %s147_s5 = sshll.u32 %s146_s4, 4  ;;  %s149_s7 = sshll.u32 %s141_s6, 4  ;;  %s148_s5 = int_to_ptr.hbm [resolvable:$true] %s147_s5  ;;  %s150_s7 = int_to_ptr.vmem [resolvable:$true] %s149_s7 }
  0x12   : > { %p745_p13 = pnand %p499_p10, %p719_p5  ;;  %p470_p0 = scmp.ge.s32.totalorder %s654_s15, 1 }
  0x13   : > { %p157_p1 = scmp.lt.s32.totalorder %s654_s15, 3  ;;  %s138_s9 = scalar_lea.sflag [#allocation3], %s137_s26 }
  0x14   : > { %s558_s10 = sshra.s32 %s148_s5, 4  ;;  %p562_p3 = pneg %p745_p13  ;;  %s559_s10 = int_to_ptr.hbm [resolvable:$true] %s558_s10 }
  0x15   : > { %s560_s11 = scalar_lea.hbm %s559_s10, 64  ;;  %s565_s20 = scalar_lea.hbm %s876_s0, 128 }
  0x16   : > { %p561_p2 = scmp.ne.s32.totalorder %s559_s10, %s560_s11  ;;  %p566_p5 = scmp.lt.s32.totalorder %s559_s10, %s876_s0 }
  0x17   : > { %p567_p8 = scmp.lt.s32.totalorder %s565_s20, %s560_s11 }
  0x18   : > { %p563_p4 = pnand %p562_p3, %p561_p2 }
  0x19   : > { %p568_p10 = por %p567_p8, %p566_p5 }
  0x1a   : > { %p564_p7 = pneg %p563_p4 }
  0x1c   : > { %p569_p9 = pnand %p568_p10, %p564_p7 }
  0x1e   : > { %572 = shalt.err (!%p569_p9)
}
  0x1f   : > { %s656_s26 = smov 256   ;;  %s657_s28 = smov 16  }
  0x20   : > { %494 = dma.hbm_to_vmem [thread:$0]  (!%p745_p13), %s148_s5, 1024, %s150_s7, %s138_s9, %s656_s26, %s656_s26, %s657_s28  }
  0x21   : > { %p158_p2 = pnand %p470_p0, %p157_p1 }
  0x22   : > { %s766_s29 = sand.u32 (!%p158_p2), 1, %s646_s13  }
  0x23   : > { %161 = sbr.rel (%p158_p2) target bundleno = 568 (0x238), region = 32  ;;  %s471_s30 = sshll.u32 (!%p158_p2), %s766_s29, 6 }
  0x24   : > { %s164_s4 = scalar_lea.sflag (!%p158_p2), [#allocation3], %s766_s29  ;;  %s167_s6 = scalar_lea.vmem (!%p158_p2), [#allocation2], %s471_s30 }
  0x28   : > { %633 = dma.done.wait (%p723_p6), %s164_s4, 1024  }
  0x29   : > { %635 = vsyncadd (%p723_p6), %s164_s4, 4294966272  ;;  %v776_v0 = vld [vmem:[%s167_s6] sm:$0xff]  ;;  %v778_v1 = vld [vmem:[%s167_s6 + $0x8] sm:$0xff]  ;;  %vm239_vm0 = vcmask 261120   ;;  %vm266_vm1 = vcmask 15360   ;;  %v224_v16 = vlaneseq  ;;  %vm229_vm2 = vcmask 130112  }
  0x2a   : > { %v780_v2 = vld [vmem:[%s167_s6 + $0x20] sm:$0xff]  ;;  %v199_v3 = vadd.f32 %v778_v1, %v776_v0  ;;  %v784_v4 = vld [vmem:[%s167_s6 + $0x28] sm:$0xff]  ;;  %v788_v6 = vld [vmem:[%s167_s6 + $0x10] sm:$0xff]  ;;  %vm233_vm3 = vcmask 195712   ;;  %vm237_vm4 = vcmask 261312   ;;  %s826_s22 = scalar_lea.vmem [#allocation5], %s471_s30 }
  0x2b   : > { %v205_v5 = vadd.f32 %v784_v4, %v780_v2  ;;  %v790_v7 = vld [vmem:[%s167_s6 + $0x18] sm:$0xff]  ;;  %v792_v8 = vld [vmem:[%s167_s6 + $0x30] sm:$0xff]  ;;  %v215_v12 = vld [vmem:[%s877_s1] sm:$0x3]  ;;  %v225_v19 = vand.u32 127, %v224_v16  ;;  %v304_v37 = vshrl.u32 %v224_v16, 7 }
  0x2c   : > { %200 = vadd.xlane.f32.xlu0 %v199_v3  ;;  %v794_v9 = vld [vmem:[%s167_s6 + $0x38] sm:$0xff]  ;;  %v202_v10 = vadd.f32 %v790_v7, %v788_v6  ;;  %473 = vmatpush.xpose.msk.msra.mxu0 %vm239_vm0, %v215_v12  ;;  %v218_v14 = vld [vmem:[%s878_s2 + $0x10] sm:$0xff]  ;;  %v217_v15 = vld [vmem:[%s878_s2 + $0x8] sm:$0xff]  ;;  %s486_s27 = sshll.u32 %s701_s16, 6  ;;  %s388_s4 = sshll.u32 %s826_s22, 4  ;;  %s389_s4 = int_to_ptr.vmem [resolvable:$true] %s388_s4 }
  0x2d   : > { %206 = vadd.xlane.f32.xlu1 %v205_v5  ;;  %v208_v11 = vadd.f32 %v794_v9, %v792_v8  ;;  %v219_v13 = vld [vmem:[%s878_s2 + $0x18] sm:$0xff]  ;;  %v227_v21 = vadd.s32 4294967288, %v225_v19  ;;  %v231_v22 = vadd.s32 4294967280, %v225_v19  ;;  %v235_v25 = vadd.s32 4294967272, %v225_v19  ;;  %v216_v36 = vld [vmem:[%s878_s2] sm:$0xff]  ;;  %537 = vset.pattern.permute.xlu2 %v304_v37  ;;  %s387_s30 = scalar_lea.hbm %s879_s3, %s486_s27  ;;  %s376_s6 = scalar_lea.sflag [#allocation4], %s766_s29 }
  0x2e   : > { %475 = vmatpush.xpose.msk.msra.mxu1 %vm266_vm1, %v219_v13  ;;  %v323_v38 = vadd.s32 24, %v304_v37  ;;  %v317_v39 = vadd.s32 16, %v304_v37  ;;  %v311_v44 = vadd.s32 8, %v304_v37  ;;  %s390_s16 = sshll.u32 %s387_s30, 4  ;;  %s608_s9 = scalar_lea.hbm %s879_s3, 128  ;;  %s391_s16 = int_to_ptr.hbm [resolvable:$true] %s390_s16 }
  0x2f   : > { %s602_s23 = sshra.s32 %s391_s16, 4  ;;  %s603_s23 = int_to_ptr.hbm [resolvable:$true] %s602_s23 }
  0x30   : > { %540 = vset.pattern.permute.xlu1 %v323_v38  ;;  %539 = vset.pattern.permute.xlu0 %v317_v39  ;;  %s604_s5 = scalar_lea.hbm %s603_s23, 64  ;;  %p609_p0 = scmp.lt.s32.totalorder %s603_s23, %s879_s3 }
  0x31   : > { %p605_p6 = scmp.ne.s32.totalorder %s603_s23, %s604_s5  ;;  %p610_p1 = scmp.lt.s32.totalorder %s608_s9, %s604_s5 }
  0x32   : > { %476 = vmatpush.xpose.msk.msra.mxu1 %vm266_vm1, %v218_v14 }
  0x33   : > { %p606_p9 = pnand %p605_p6, %p730_p11  ;;  %p611_p3 = por %p610_p1, %p609_p0 }
  0x34   : > { %203 = vadd.xlane.f32.xlu0 %v202_v10 }
  0x35   : > { %209 = vadd.xlane.f32.xlu1 %v208_v11  ;;  %p607_p13 = pneg %p606_p9 }
  0x36   : > { %477 = vmatpush.xpose.msk.msra.mxu1 %vm266_vm1, %v217_v15 }
  0x37   : > { %p612_p4 = pnand %p611_p3, %p607_p13 }
  0x3a   : > { %478 = vmatpush.xpose.msk.msra.mxu1 %vm266_vm1, %v216_v36 }
  0x9f   : > { %v201_v17 = vpop.xlane.xlu0 %200 }
  0xa0   : > { %v207_v18 = vpop.xlane.xlu1 %206  ;;  %v211_v20 = vmul.f32 0.00390625, %v201_v17 }
  0xa1   : > { %v213_v23 = vmul.f32 0.00390625, %v207_v18 }
  0xa2   : > { %v226_v29 = vperm.slane %v211_v20, %v225_v19 }
  0xa3   : > { %v232_v31 = vperm.slane %v213_v23, %v231_v22 }
  0xa7   : > { %v204_v24 = vpop.xlane.xlu0 %203 }
  0xa8   : > { %v212_v26 = vmul.f32 0.00390625, %v204_v24  ;;  %v210_v27 = vpop.xlane.xlu1 %209 }
  0xa9   : > { %v214_v28 = vmul.f32 0.00390625, %v210_v27 }
  0xaa   : > { %v228_v30 = vperm.slane %v212_v26, %v227_v21 }
  0xab   : > { %v236_v32 = vperm.slane %v214_v28, %v235_v25 }
  0xac   : > { %v230_v33 = vsel %vm229_vm2, %v228_v30, %v226_v29 }
  0xad   : > { %v234_v34 = vsel %vm233_vm3, %v232_v31, %v230_v33 }
  0xae   : > { %v238_v35 = vsel %vm237_vm4, %v236_v32, %v234_v34 }
  0xaf   : > { %474 = vmatmul.msk.f32.vlgmr.msra.gmra.mxu0 %vm239_vm0, %v238_v35 }
 0x12c   : > { %v262_v40 = vpop.f32.mrf.mxu0 }
 0x12d   : > { %v265_v41 = vmax.f32 %v262_v40, 0.0 }
 0x12f   : > { %479 = vmatmul.msk.f32.vlgmr.msra.gmra.mxu1 %vm266_vm1, %v265_v41 }
 0x1ac   : > { %v299_v42 = vpop.f32.mrf.mxu1 }
 0x1ad   : > { %v302_v43 = vperm.slane %v299_v42, 0 }
 0x1af   : > { %325 = vperm.xlu1 %540, %v302_v43   ;;  %319 = vperm.xlu0 %539, %v302_v43  }
 0x1b0   : > { %307 = vperm.xlu2 %537, %v302_v43  }
 0x1b7   : > { %541 = vset.pattern.permute.xlu0 %v323_v38 }
 0x1b8   : > { %538 = vset.pattern.permute.xlu2 %v311_v44 }
 0x1c0   : > { %313 = vperm.xlu2 %538, %v302_v43  }
 0x20a   : > { %v308_v45 = vpop.permute.xlu2 %307 }
 0x20b   : > { %v327_v46 = vmul.f32 %v308_v45, %v776_v0  ;;  %v328_v47 = vmul.f32 %v308_v45, %v778_v1 }
 0x20d   : > { %v335_v48 = vmul.f32 0.5, %v327_v46  ;;  %v336_v49 = vmul.f32 0.5, %v328_v47 }
 0x20f   : > { %542 = vtanh.f32 %v335_v48 }
 0x210   : > { %544 = vtanh.f32 %v336_v49 }
 0x215   : > { %v543_v50 = vpop.eup %542 }
 0x216   : > { %v545_v51 = vpop.eup %544  ;;  %v351_v52 = vadd.f32 1.0, %v543_v50 }
 0x217   : > { %v352_v53 = vadd.f32 1.0, %v545_v51 }
 0x218   : > { %v359_v54 = vmul.f32 0.5, %v351_v52 }
 0x219   : > { %v360_v55 = vmul.f32 0.5, %v352_v53 }
 0x21a   : > { %367 = vst [vmem:[%s826_s22] sm:$0xff] %v359_v54  ;;  %v314_v56 = vpop.permute.xlu2 %313 }
 0x21b   : > { %368 = vst [vmem:[%s826_s22 + $0x8] sm:$0xff] %v360_v55  ;;  %v329_v57 = vmul.f32 %v314_v56, %v788_v6  ;;  %v330_v58 = vmul.f32 %v314_v56, %v790_v7 }
 0x21d   : > { %v337_v59 = vmul.f32 0.5, %v329_v57  ;;  %v338_v60 = vmul.f32 0.5, %v330_v58 }
 0x21f   : > { %546 = vtanh.f32 %v337_v59 }
 0x220   : > { %548 = vtanh.f32 %v338_v60 }
 0x221   : > { %v326_v61 = vpop.permute.xlu1 %325  ;;  %v320_v62 = vpop.permute.xlu0 %319 }
 0x222   : > { %v333_v63 = vmul.f32 %v326_v61, %v792_v8  ;;  %v334_v0 = vmul.f32 %v326_v61, %v794_v9  ;;  %v331_v1 = vmul.f32 %v320_v62, %v780_v2  ;;  %v332_v3 = vmul.f32 %v320_v62, %v784_v4 }
 0x224   : > { %v341_v5 = vmul.f32 0.5, %v333_v63  ;;  %v342_v6 = vmul.f32 0.5, %v334_v0  ;;  %v339_v7 = vmul.f32 0.5, %v331_v1  ;;  %v340_v11 = vmul.f32 0.5, %v332_v3 }
 0x225   : > { %v547_v10 = vpop.eup %546 }
 0x226   : > { %v549_v12 = vpop.eup %548  ;;  %v353_v13 = vadd.f32 1.0, %v547_v10  ;;  %550 = vtanh.f32 %v341_v5 }
 0x227   : > { %v354_v14 = vadd.f32 1.0, %v549_v12  ;;  %552 = vtanh.f32 %v342_v6 }
 0x228   : > { %v361_v8 = vmul.f32 0.5, %v353_v13  ;;  %554 = vtanh.f32 %v339_v7 }
 0x229   : > { %v362_v9 = vmul.f32 0.5, %v354_v14  ;;  %556 = vtanh.f32 %v340_v11 }
 0x22a   : > { %369 = vst [vmem:[%s826_s22 + $0x10] sm:$0xff] %v361_v8 }
 0x22b   : > { %370 = vst [vmem:[%s826_s22 + $0x18] sm:$0xff] %v362_v9 }
 0x22c   : > { %v551_v2 = vpop.eup %550 }
 0x22d   : > { %v553_v4 = vpop.eup %552  ;;  %v357_v15 = vadd.f32 1.0, %v551_v2 }
 0x22e   : > { %v555_v16 = vpop.eup %554  ;;  %v358_v17 = vadd.f32 1.0, %v553_v4 }
 0x22f   : > { %v557_v18 = vpop.eup %556  ;;  %v365_v19 = vmul.f32 0.5, %v357_v15  ;;  %v355_v20 = vadd.f32 1.0, %v555_v16 }
 0x230   : > { %v366_v21 = vmul.f32 0.5, %v358_v17  ;;  %v356_v22 = vadd.f32 1.0, %v557_v18 }
 0x231   : > { %373 = vst [vmem:[%s826_s22 + $0x30] sm:$0xff] %v365_v19  ;;  %v363_v23 = vmul.f32 0.5, %v355_v20 }
 0x232   : > { %374 = vst [vmem:[%s826_s22 + $0x38] sm:$0xff] %v366_v21  ;;  %v364_v24 = vmul.f32 0.5, %v356_v22 }
 0x233   : > { %371 = vst [vmem:[%s826_s22 + $0x20] sm:$0xff] %v363_v23 }
 0x234   : > { %372 = vst [vmem:[%s826_s22 + $0x28] sm:$0xff] %v364_v24 }
 0x235   : > { %615 = shalt.err (!%p612_p4)
}
 0x236   : > { %s658_s29 = smov 256   ;;  %s659_s17 = smov 16  }
 0x237   : > { %489 = dma.vmem_to_hbm [thread:$0]  (%p730_p11), %s389_s4, 1024, %s391_s16, %s376_s6, %s658_s29, %s658_s29, %s659_s17  }
 0x238 PF: > { %s405_s19 = sand.u32 1, %s642_s12   ;;  %p885_p7 = scmp.ge.s32.totalorder %s654_s15, 2 }
 0x239   : > { %s406_s20 = scalar_lea.sflag [#allocation4], %s405_s19 }
 0x23a   : > { %p496_p5 = pnand %p885_p7, %p734_p12 }
 0x23c   : > { %p497_p8 = pneg %p496_p5 }
 0x23e   : > { %637 = dma.done.wait (%p497_p8), %s406_s20, 1024  }
 0x23f   : > { %639 = vsyncadd (%p497_p8), %s406_s20, 4294966272  ;;  %p16_p10 = scmp.ge.s32.totalorder %s705_s18, 4   ;;  %s886_s12 = smov %s646_s13 }
 0x240   : > { %s887_s13 = smov %s650_s14  ;;  %s888_s14 = smov %s717_s21 }
 0x241   : > { %s889_s15 = smov %s705_s18  ;;  %18 = sbr.rel (!%p16_p10) target bundleno = 5 (0x5), region = 77 }
 0x246   :  { %412 = vsyncpa [#allocation3], 1 }
 0x247   :  { %414 = vsyncpa [#allocation3 + $0x1], 1 }
 0x248   :  { %415 = vsyncpa [#allocation4], 1 }
 0x249   :  { %417 = vsyncpa [#allocation4 + $0x1], 1 }

</bundles_post_ra>
